<compile_context>
chip_gen: v7x
topology: tpu7x:2x2x1
jax: 0.10.0
libtpu: 0.0.40
codegen_flags: <defaults>
</compile_context>

<pallas_src>
import functools

import jax
import jax.numpy as jnp
from jax.experimental import pallas as pl
from jax.experimental.pallas import tpu as pltpu


_NEG_MASK = -1e30   # additive bias for non-edges


# --------------------------------------------------------------------------
# Projection kernel: h = x @ W  (row-tiled, parallel)
# --------------------------------------------------------------------------
def _proj_kernel(x_ref, w_ref, h_ref):
    h_ref[...] = jnp.dot(x_ref[...].astype(jnp.bfloat16), w_ref[...],
                         preferred_element_type=jnp.float32).astype(h_ref.dtype)


def _project(x, w, *, tm):
    n, f = x.shape
    hc = w.shape[1]
    tm = tm if n % tm == 0 else n   # TODO(synk): pad the ragged last tile instead
    return pl.pallas_call(
        _proj_kernel,
        out_shape=jax.ShapeDtypeStruct((n, hc), jnp.bfloat16),
        grid_spec=pltpu.PrefetchScalarGridSpec(
            num_scalar_prefetch=0,
            grid=(n // tm,),
            in_specs=[pl.BlockSpec((tm, f), lambda i: (i, 0)),
                      pl.BlockSpec((f, hc), lambda i: (0, 0))],
            out_specs=pl.BlockSpec((tm, hc), lambda i: (i, 0))),
        compiler_params=pltpu.CompilerParams(
            dimension_semantics=("parallel",)),
    )(x, w)


# --------------------------------------------------------------------------
# GAT layer kernel: grid = (row tiles [parallel], heads [arbitrary])
# --------------------------------------------------------------------------
def _gat_layer_kernel(ht_ref, hf_ref, bias_ref, a_src_ref, a_dst_ref, b_ref,
                      o_ref, acc_scr, s_dst_scr, s_src_scr,
                      *, heads, out_ch, activation, exp_dtype):
    hd = pl.program_id(1)
    hc = heads * out_ch

    @pl.when(hd == 0)
    def _init():
        # Per-tile target scores [TM, H] and all-source scores [H, N] from two
        # small block-structured matmuls (bf16 in, f32 acc). Recomputed once
        # per row tile (cheap) so the row axis can stay "parallel".
        s_dst_scr[...] = jnp.dot(ht_ref[...], a_dst_ref[...],
                                 preferred_element_type=jnp.float32)
        s_src_scr[...] = jax.lax.dot_general(
            a_src_ref[...], hf_ref[...], (((0,), (1,)), ((), ())),
            preferred_element_type=jnp.float32)
        acc_scr[...] = jnp.zeros_like(acc_scr)

    # Head-hd target scores as a [TM, 1] column (lane-select + tiny reduce over
    # 'heads' lanes -- avoids a dynamic lane slice) and source scores [1, N]
    # via a dynamic sublane slice.
    if heads == 1:
        s_d = s_dst_scr[...]                                   # [TM, 1]
    else:
        lane_h = jax.lax.broadcasted_iota(jnp.int32, (1, heads), 1)
        s_d = jnp.sum(jnp.where(lane_h == hd, s_dst_scr[...], 0.0),
                      axis=-1, keepdims=True)                  # [TM, 1]
    s_s = s_src_scr[pl.ds(hd, 1), :]                           # [1, N]

    # Cheap per-row shift bound c_i >= max_j leaky(s_d_i + s_s_j): saves the
    # full [TM, N] row-max pass (any upper bound is a valid softmax shift).
    t = s_d + jnp.max(s_s, axis=-1, keepdims=True)
    c = jnp.maximum(t, 0.2 * t)

    # e_ij = leaky_relu(s_d_i + s_s_j, 0.2) with additive -1e30 off-edge bias.
    e = s_d + s_s + bias_ref[...]                              # [TM, N]
    e = jnp.maximum(e, 0.2 * e)                                # leaky_relu(., 0.2)
    p = jnp.exp((e - c).astype(exp_dtype))                     # unnormalized weights
    denom = jnp.sum(p, axis=-1, keepdims=True).astype(jnp.float32)
    inv = pl.reciprocal(jnp.maximum(denom, 1e-30), approx=True)   # EUP slot

    # Aggregate with the FULL-width bf16 RHS (64 output lanes cost the same MXU
    # passes as 8) and keep only this head's columns via a lane select.
    agg = jnp.dot(p.astype(jnp.bfloat16), hf_ref[...],
                  preferred_element_type=jnp.float32)          # [TM, H*C]
    contrib = agg * inv
    if heads == 1:
        acc_scr[...] = contrib
    else:
        lane = jax.lax.broadcasted_iota(jnp.int32, (1, hc), 1)
        lo = hd * out_ch
        sel = (lane >= lo) & (lane < lo + out_ch)
        acc_scr[...] = jnp.where(sel, contrib, acc_scr[...])

    @pl.when(hd == heads - 1)
    def _finalize():
        v = acc_scr[...] + b_ref[...]
        if activation == "elu":
            v = jnp.where(v > 0, v, jnp.exp(jnp.minimum(v, 0.0)) - 1.0)
        elif activation == "log_softmax":
            m = jnp.max(v, axis=-1, keepdims=True)
            z = v - m
            v = z - jnp.log(jnp.sum(jnp.exp(z), axis=-1, keepdims=True))
        o_ref[...] = v.astype(o_ref.dtype)     # one lane-dense [TM, out] store


def _gat_layer(h, attn_bias, a_src_blk, a_dst_blk, b, *, heads, out_ch,
               activation, out_dtype, tm, exp_dtype):
    n, hc = h.shape
    assert hc == heads * out_ch
    tm = tm if n % tm == 0 else n   # TODO(synk): pad the ragged last tile instead
    kernel = functools.partial(_gat_layer_kernel, heads=heads, out_ch=out_ch,
                               activation=activation, exp_dtype=exp_dtype)
    # NOTE: at Cora scale (N~2708, TM~256) the per-step footprint is a few MB;
    # raise vmem_limit_bytes on v5e (16 MiB default scoped) if TM grows.
    return pl.pallas_call(
        kernel,
        out_shape=jax.ShapeDtypeStruct((n, hc), out_dtype),
        grid_spec=pltpu.PrefetchScalarGridSpec(
            num_scalar_prefetch=0,
            grid=(n // tm, heads),
            in_specs=[
                pl.BlockSpec((tm, hc), lambda i, hd: (i, 0)),     # target-tile features
                pl.BlockSpec((n, hc), lambda i, hd: (0, 0)),      # all-source features (resident)
                pl.BlockSpec((tm, n), lambda i, hd: (i, 0)),      # additive mask rows
                pl.BlockSpec((hc, heads), lambda i, hd: (0, 0)),  # att_src block matrix
                pl.BlockSpec((hc, heads), lambda i, hd: (0, 0)),  # att_dst block matrix
                pl.BlockSpec((1, hc), lambda i, hd: (0, 0)),      # layer bias
            ],
            out_specs=pl.BlockSpec((tm, hc), lambda i, hd: (i, 0)),
            scratch_shapes=[
                pltpu.VMEM((tm, hc), jnp.float32),     # per-tile head accumulator
                pltpu.VMEM((tm, heads), jnp.float32),  # target scores, all heads
                pltpu.VMEM((heads, n), jnp.float32),   # source scores, all heads
            ]),
        compiler_params=pltpu.CompilerParams(
            dimension_semantics=("parallel", "arbitrary")),
    )(h, h, attn_bias, a_src_blk, a_dst_blk, b)


# --------------------------------------------------------------------------
# Forward + parameter / graph preparation
# --------------------------------------------------------------------------
def _attn_exp_dtype():
    # bf16 EUP exists on v6e/v7x (2x exp throughput, half the p footprint);
    # v5e and older have no bf16 VPU/EUP so the exp chain stays in f32 there.
    try:
        kind = jax.devices()[0].device_kind.lower()
    except Exception:
        kind = ""
    return jnp.bfloat16 if ("v6" in kind or "v7" in kind) else jnp.float32


def pygat_forward(x, attn_bias, params, *, tm=16):
    """Eval-mode PyGAT forward (all dropouts identity)."""
    heads1 = params["a_src1_blk"].shape[1]
    c1 = params["a_src1_blk"].shape[0] // heads1
    c2 = params["a_src2_blk"].shape[0]
    exp_dtype = _attn_exp_dtype()

    # conv1: GATConv(F, c1, heads=heads1, concat) + ELU
    h1p = _project(x, params["w1"], tm=tm)                      # [N, 64] bf16
    h1 = _gat_layer(h1p, attn_bias, params["a_src1_blk"], params["a_dst1_blk"],
                    params["b1"], heads=heads1, out_ch=c1, activation="elu",
                    out_dtype=jnp.bfloat16, tm=tm, exp_dtype=exp_dtype)
    # conv2: GATConv(64, C, heads=1, concat) + log_softmax
    h2p = _project(h1, params["w2"], tm=tm)                     # [N, C] bf16
    return _gat_layer(h2p, attn_bias, params["a_src2_blk"], params["a_dst2_blk"],
                      params["b2"], heads=1, out_ch=c2, activation="log_softmax",
                      out_dtype=jnp.float32, tm=tm, exp_dtype=exp_dtype)


def _att_block(att):
    """[H, C] attention vectors -> [H*C, H] block matrix A with A[h*C+c, h] =
    att[h, c], so (h_proj @ A)[:, h] = <h_proj^{(h)}, att^{(h)}> (bf16 operand)."""
    n_heads, out_ch = att.shape
    eye = jnp.eye(n_heads, dtype=jnp.float32)
    blk = (att.astype(jnp.float32)[:, :, None] * eye[:, None, :]
           ).reshape(n_heads * out_ch, n_heads)
    return blk.astype(jnp.bfloat16)


def prepare_params(params):
    """One-time conversion to kernel-ready operands (done OUTSIDE the forward
    so there are no per-call wrapper casts)."""
    return {
        "w1": params["w1"].astype(jnp.bfloat16),
        "a_src1_blk": _att_block(params["att_src1"]),
        "a_dst1_blk": _att_block(params["att_dst1"]),
        "b1": params["b1"].astype(jnp.float32),
        "w2": params["w2"].astype(jnp.bfloat16),
        "a_src2_blk": _att_block(params["att_src2"]),
        "a_dst2_blk": _att_block(params["att_dst2"]),
        "b2": params["b2"].astype(jnp.float32),
    }


def edge_index_to_attn_bias(edge_index, num_nodes):
    """Dense additive attention bias: 0 where edge j->i (self-loops added),
    -1e30 otherwise. Built once, in its final dtype, at graph construction."""
    src, dst = edge_index[0], edge_index[1]
    adj = jnp.zeros((num_nodes, num_nodes), jnp.float32)
    adj = adj.at[dst, src].set(1.0)
    adj = jnp.maximum(adj, jnp.eye(num_nodes, dtype=jnp.float32))
    return jnp.where(adj > 0, 0.0, _NEG_MASK).astype(jnp.float32)


def init_params(key, num_features, num_classes, hidden=8, heads=8):
    """f32 parameters matching PyG GATConv layouts (lin has no bias)."""
    ks = jax.random.split(key, 6)

    def glorot(k, shape):
        fan_in, fan_out = shape[0], shape[-1]
        lim = (6.0 / (fan_in + fan_out)) ** 0.5
        return jax.random.uniform(k, shape, jnp.float32, -lim, lim)

    return {
        "w1": glorot(ks[0], (num_features, heads * hidden)),
        "att_src1": glorot(ks[1], (heads, hidden)),
        "att_dst1": glorot(ks[2], (heads, hidden)),
        "b1": jnp.zeros((1, heads * hidden), jnp.float32),
        "w2": glorot(ks[3], (heads * hidden, num_classes)),
        "att_src2": glorot(ks[4], (1, num_classes)),
        "att_dst2": glorot(ks[5], (1, num_classes)),
        "b2": jnp.zeros((1, num_classes), jnp.float32),
    }


if __name__ == "__main__":
    N = 32            # nodes (2 row tiles of TM=16 -> exercises the parallel grid axis)
    F = 16            # num_features
    NUM_CLASSES = 4
    HIDDEN = 8
    HEADS = 8
    TM = 16

    key = jax.random.PRNGKey(0)
    k_x, k_p = jax.random.split(key)

    # Node features [N, F]
    x = jax.random.normal(k_x, (N, F), jnp.float32)

    # Deterministic bidirectional ring graph: edge_index [2, 2N]
    i = jnp.arange(N, dtype=jnp.int32)
    src = jnp.concatenate([i, (i + 1) % N])
    dst = jnp.concatenate([(i + 1) % N, i])
    edge_index = jnp.stack([src, dst], axis=0)                 # [2, 64]
    attn_bias = edge_index_to_attn_bias(edge_index, N)         # [N, N], 0 / -1e30

    params = prepare_params(
        init_params(k_p, F, NUM_CLASSES, hidden=HIDDEN, heads=HEADS))

    fwd = jax.jit(functools.partial(pygat_forward, tm=TM))
    out = jax.block_until_ready(fwd(x, attn_bias, params))

    assert out.shape == (N, NUM_CLASSES)
    assert bool(jnp.all(jnp.isfinite(out)))
    # log_softmax rows must exponentiate to a probability distribution
    row_sums = jnp.exp(out).sum(axis=1)
    assert bool(jnp.all(jnp.abs(row_sums - 1.0) < 1e-4))

    print("KERNEL_OK")
</pallas_src>

<mosaic_0001>
module attributes {stable_mosaic.version = 11 : i64} {
  func.func @_proj_kernel(%arg0: i32, %arg1: memref<16x16xf32, #tpu.memory_space<vmem>>, %arg2: memref<16x64xbf16, #tpu.memory_space<vmem>>, %arg3: memref<16x64xbf16, #tpu.memory_space<vmem>>) attributes {dimension_semantics = [#tpu.dimension_semantics<parallel>], iteration_bounds = array<i64: 2>, scalar_prefetch = 0 : i64, scratch_operands = 0 : i64, tpu.core_type = #tpu.core_type<tc>, window_params = [{transform_indices = @transform_0, window_bounds = array<i64: 16, 16>}, {pipeline_mode = #tpu.pipeline_mode<synchronous>, transform_indices = @transform_1, window_bounds = array<i64: 16, 64>}, {transform_indices = @transform_2, window_bounds = array<i64: 16, 64>}]} {
    %c0 = arith.constant 0 : index
    %c0_0 = arith.constant 0 : index
    %0 = vector.load %arg1[%c0, %c0_0] : memref<16x16xf32, #tpu.memory_space<vmem>>, vector<16x16xf32>
    %1 = arith.truncf %0 : vector<16x16xf32> to vector<16x16xbf16>
    %c0_1 = arith.constant 0 : index
    %c0_2 = arith.constant 0 : index
    %2 = vector.load %arg2[%c0_1, %c0_2] : memref<16x64xbf16, #tpu.memory_space<vmem>>, vector<16x64xbf16>
    %cst = arith.constant dense<0.000000e+00> : vector<16x64xf32>
    %3 = tpu.matmul %1, %2, %cst {dimension_numbers = #tpu.dot_dimension_numbers<[1], [0], [0], [1], [0, 0, 1, 1], [], []>} : vector<16x16xbf16>, vector<16x64xbf16>, vector<16x64xf32> -> vector<16x64xf32>
    %4 = arith.truncf %3 : vector<16x64xf32> to vector<16x64xbf16>
    %c0_3 = arith.constant 0 : index
    %c0_4 = arith.constant 0 : index
    %5 = vector.load %arg3[%c0_3, %c0_4] : memref<16x64xbf16, #tpu.memory_space<vmem>>, vector<16x64xbf16>
    tpu.vector_store %arg3[%c0_3, %c0_4], %4 {strides = array<i32>} : memref<16x64xbf16, #tpu.memory_space<vmem>>, vector<16x64xbf16>,
    return
  }
  func.func @transform_0(%arg0: i32) -> (i32, i32) {
    %c0_i32 = arith.constant 0 : i32
    %c0_i32_0 = arith.constant 0 : i32
    return %arg0, %c0_i32 : i32, i32
  }
  func.func @transform_1(%arg0: i32) -> (i32, i32) {
    %c0_i32 = arith.constant 0 : i32
    %c0_i32_0 = arith.constant 0 : i32
    %c0_i32_1 = arith.constant 0 : i32
    return %c0_i32, %c0_i32_0 : i32, i32
  }
  func.func @transform_2(%arg0: i32) -> (i32, i32) {
    %c0_i32 = arith.constant 0 : i32
    %c0_i32_0 = arith.constant 0 : i32
    return %arg0, %c0_i32 : i32, i32
  }
}

module attributes {stable_mosaic.version = 11 : i64} {
  func.func @_gat_layer_kernel(%arg0: i32, %arg1: i32, %arg2: memref<16x64xbf16, #tpu.memory_space<vmem>>, %arg3: memref<32x64xbf16, #tpu.memory_space<vmem>>, %arg4: memref<16x32xf32, #tpu.memory_space<vmem>>, %arg5: memref<64x8xbf16, #tpu.memory_space<vmem>>, %arg6: memref<64x8xbf16, #tpu.memory_space<vmem>>, %arg7: memref<1x64xf32, #tpu.memory_space<vmem>>, %arg8: memref<16x64xbf16, #tpu.memory_space<vmem>>, %arg9: memref<16x64xf32, #tpu.memory_space<vmem>>, %arg10: memref<16x8xf32, #tpu.memory_space<vmem>>, %arg11: memref<8x32xf32, #tpu.memory_space<vmem>>) attributes {dimension_semantics = [#tpu.dimension_semantics<parallel>, #tpu.dimension_semantics<arbitrary>], iteration_bounds = array<i64: 2, 8>, scalar_prefetch = 0 : i64, scratch_operands = 3 : i64, tpu.core_type = #tpu.core_type<tc>, window_params = [{transform_indices = @transform_0, window_bounds = array<i64: 16, 64>}, {pipeline_mode = #tpu.pipeline_mode<synchronous>, transform_indices = @transform_1, window_bounds = array<i64: 32, 64>}, {transform_indices = @transform_2, window_bounds = array<i64: 16, 32>}, {pipeline_mode = #tpu.pipeline_mode<synchronous>, transform_indices = @transform_3, window_bounds = array<i64: 64, 8>}, {pipeline_mode = #tpu.pipeline_mode<synchronous>, transform_indices = @transform_4, window_bounds = array<i64: 64, 8>}, {pipeline_mode = #tpu.pipeline_mode<synchronous>, transform_indices = @transform_5, window_bounds = array<i64: 1, 64>}, {transform_indices = @transform_6, window_bounds = array<i64: 16, 64>}]} {
    %c0_i32 = arith.constant 0 : i32
    %0 = arith.cmpi eq, %arg1, %c0_i32 : i32
    %1 = arith.extui %0 : i1 to i32
    %c0_i32_0 = arith.constant 0 : i32
    %2 = arith.cmpi ne, %1, %c0_i32_0 : i32
    scf.if %2 {
      %c0_20 = arith.constant 0 : index
      %c0_21 = arith.constant 0 : index
      %59 = vector.load %arg2[%c0_20, %c0_21] : memref<16x64xbf16, #tpu.memory_space<vmem>>, vector<16x64xbf16>
      %c0_22 = arith.constant 0 : index
      %c0_23 = arith.constant 0 : index
      %60 = vector.load %arg6[%c0_22, %c0_23] : memref<64x8xbf16, #tpu.memory_space<vmem>>, vector<64x8xbf16>
      %cst_24 = arith.constant dense<0.000000e+00> : vector<16x8xf32>
      %61 = tpu.matmul %59, %60, %cst_24 {dimension_numbers = #tpu.dot_dimension_numbers<[1], [0], [0], [1], [0, 0, 1, 1], [], []>} : vector<16x64xbf16>, vector<64x8xbf16>, vector<16x8xf32> -> vector<16x8xf32>
      %c0_25 = arith.constant 0 : index
      %c0_26 = arith.constant 0 : index
      %62 = vector.load %arg10[%c0_25, %c0_26] : memref<16x8xf32, #tpu.memory_space<vmem>>, vector<16x8xf32>
      tpu.vector_store %arg10[%c0_25, %c0_26], %61 {strides = array<i32>} : memref<16x8xf32, #tpu.memory_space<vmem>>, vector<16x8xf32>,
      %c0_27 = arith.constant 0 : index
      %c0_28 = arith.constant 0 : index
      %63 = vector.load %arg5[%c0_27, %c0_28] : memref<64x8xbf16, #tpu.memory_space<vmem>>, vector<64x8xbf16>
      %c0_29 = arith.constant 0 : index
      %c0_30 = arith.constant 0 : index
      %64 = vector.load %arg3[%c0_29, %c0_30] : memref<32x64xbf16, #tpu.memory_space<vmem>>, vector<32x64xbf16>
      %cst_31 = arith.constant dense<0.000000e+00> : vector<8x32xf32>
      %65 = tpu.matmul %63, %64, %cst_31 {dimension_numbers = #tpu.dot_dimension_numbers<[0], [1], [1], [0], [0, 1, 1, 0], [], []>} : vector<64x8xbf16>, vector<32x64xbf16>, vector<8x32xf32> -> vector<8x32xf32>
      %c0_32 = arith.constant 0 : index
      %c0_33 = arith.constant 0 : index
      %66 = vector.load %arg11[%c0_32, %c0_33] : memref<8x32xf32, #tpu.memory_space<vmem>>, vector<8x32xf32>
      tpu.vector_store %arg11[%c0_32, %c0_33], %65 {strides = array<i32>} : memref<8x32xf32, #tpu.memory_space<vmem>>, vector<8x32xf32>,
      %cst_34 = arith.constant 0.000000e+00 : f32
      %67 = vector.broadcast %cst_34 : f32 to vector<16x64xf32>
      %c0_35 = arith.constant 0 : index
      %c0_36 = arith.constant 0 : index
      %68 = vector.load %arg9[%c0_35, %c0_36] : memref<16x64xf32, #tpu.memory_space<vmem>>, vector<16x64xf32>
      tpu.vector_store %arg9[%c0_35, %c0_36], %67 {strides = array<i32>} : memref<16x64xf32, #tpu.memory_space<vmem>>, vector<16x64xf32>,
    } else {
    }
    %3 = tpu.iota {dimensions = array<i32: 1>} : vector<1x8xi32>
    %4 = vector.broadcast %arg1 : i32 to vector<1x8xi32>
    %5 = arith.cmpi eq, %3, %4 : vector<1x8xi32>
    %c0 = arith.constant 0 : index
    %c0_1 = arith.constant 0 : index
    %6 = vector.load %arg10[%c0, %c0_1] : memref<16x8xf32, #tpu.memory_space<vmem>>, vector<16x8xf32>
    %cst = arith.constant 0.000000e+00 : f32
    %7 = vector.shape_cast %5 : vector<1x8xi1> to vector<1x8xi1>
    %8 = vector.broadcast %7 : vector<1x8xi1> to vector<16x8xi1>
    %9 = vector.broadcast %cst : f32 to vector<16x8xf32>
    %10 = arith.select %8, %6, %9 : vector<16x8xi1>, vector<16x8xf32>
    %cst_2 = arith.constant dense<0.000000e+00> : vector<16xf32>
    %11 = vector.multi_reduction <add>, %10, %cst_2 [1] : vector<16x8xf32> to vector<16xf32>
    %12 = vector.shape_cast %11 : vector<16xf32> to vector<16x1xf32>
    %13 = arith.index_cast %arg1 : i32 to index
    %c0_3 = arith.constant 0 : index
    %14 = vector.load %arg11[%13, %c0_3] : memref<8x32xf32, #tpu.memory_space<vmem>>, vector<1x32xf32>
    %cst_4 = arith.constant dense<0xFF800000> : vector<1xf32>
    %15 = vector.multi_reduction <maximumf>, %14, %cst_4 [1] : vector<1x32xf32> to vector<1xf32>
    %16 = vector.shape_cast %15 : vector<1xf32> to vector<1x1xf32>
    %17 = vector.broadcast %16 : vector<1x1xf32> to vector<16x1xf32>
    %18 = arith.addf %12, %17 : vector<16x1xf32>
    %cst_5 = arith.constant 2.000000e-01 : f32
    %19 = vector.broadcast %cst_5 : f32 to vector<16x1xf32>
    %20 = arith.mulf %19, %18 : vector<16x1xf32>
    %21 = arith.maximumf %18, %20 : vector<16x1xf32>
    %22 = vector.broadcast %12 : vector<16x1xf32> to vector<16x32xf32>
    %23 = vector.broadcast %14 : vector<1x32xf32> to vector<16x32xf32>
    %24 = arith.addf %22, %23 : vector<16x32xf32>
    %c0_6 = arith.constant 0 : index
    %c0_7 = arith.constant 0 : index
    %25 = vector.load %arg4[%c0_6, %c0_7] : memref<16x32xf32, #tpu.memory_space<vmem>>, vector<16x32xf32>
    %26 = arith.addf %24, %25 : vector<16x32xf32>
    %cst_8 = arith.constant 2.000000e-01 : f32
    %27 = vector.broadcast %cst_8 : f32 to vector<16x32xf32>
    %28 = arith.mulf %27, %26 : vector<16x32xf32>
    %29 = arith.maximumf %26, %28 : vector<16x32xf32>
    %30 = vector.broadcast %21 : vector<16x1xf32> to vector<16x32xf32>
    %31 = arith.subf %29, %30 : vector<16x32xf32>
    %32 = math.exp %31 : vector<16x32xf32>
    %cst_9 = arith.constant dense<0.000000e+00> : vector<16xf32>
    %33 = vector.multi_reduction <add>, %32, %cst_9 [1] : vector<16x32xf32> to vector<16xf32>
    %34 = vector.shape_cast %33 : vector<16xf32> to vector<16x1xf32>
    %cst_10 = arith.constant 1.000000e-30 : f32
    %35 = vector.broadcast %cst_10 : f32 to vector<16x1xf32>
    %36 = arith.maximumf %34, %35 : vector<16x1xf32>
    %37 = tpu.reciprocal %36 {approx = true} : vector<16x1xf32> -> vector<16x1xf32>
    %38 = arith.truncf %32 : vector<16x32xf32> to vector<16x32xbf16>
    %c0_11 = arith.constant 0 : index
    %c0_12 = arith.constant 0 : index
    %39 = vector.load %arg3[%c0_11, %c0_12] : memref<32x64xbf16, #tpu.memory_space<vmem>>, vector<32x64xbf16>
    %cst_13 = arith.constant dense<0.000000e+00> : vector<16x64xf32>
    %40 = tpu.matmul %38, %39, %cst_13 {dimension_numbers = #tpu.dot_dimension_numbers<[1], [0], [0], [1], [0, 0, 1, 1], [], []>} : vector<16x32xbf16>, vector<32x64xbf16>, vector<16x64xf32> -> vector<16x64xf32>
    %41 = vector.broadcast %37 : vector<16x1xf32> to vector<16x64xf32>
    %42 = arith.mulf %40, %41 : vector<16x64xf32>
    %43 = tpu.iota {dimensions = array<i32: 1>} : vector<1x64xi32>
    %c8_i32 = arith.constant 8 : i32
    %44 = arith.muli %arg1, %c8_i32 : i32
    %45 = vector.broadcast %44 : i32 to vector<1x64xi32>
    %46 = arith.cmpi sge, %43, %45 : vector<1x64xi32>
    %c8_i32_14 = arith.constant 8 : i32
    %47 = arith.addi %44, %c8_i32_14 : i32
    %48 = vector.broadcast %47 : i32 to vector<1x64xi32>
    %49 = arith.cmpi slt, %43, %48 : vector<1x64xi32>
    %50 = arith.andi %46, %49 : vector<1x64xi1>
    %c0_15 = arith.constant 0 : index
    %c0_16 = arith.constant 0 : index
    %51 = vector.load %arg9[%c0_15, %c0_16] : memref<16x64xf32, #tpu.memory_space<vmem>>, vector<16x64xf32>
    %52 = vector.shape_cast %50 : vector<1x64xi1> to vector<1x64xi1>
    %53 = vector.broadcast %52 : vector<1x64xi1> to vector<16x64xi1>
    %54 = arith.select %53, %42, %51 : vector<16x64xi1>, vector<16x64xf32>
    %c0_17 = arith.constant 0 : index
    %c0_18 = arith.constant 0 : index
    %55 = vector.load %arg9[%c0_17, %c0_18] : memref<16x64xf32, #tpu.memory_space<vmem>>, vector<16x64xf32>
    tpu.vector_store %arg9[%c0_17, %c0_18], %54 {strides = array<i32>} : memref<16x64xf32, #tpu.memory_space<vmem>>, vector<16x64xf32>,
    %c7_i32 = arith.constant 7 : i32
    %56 = arith.cmpi eq, %arg1, %c7_i32 : i32
    %57 = arith.extui %56 : i1 to i32
    %c0_i32_19 = arith.constant 0 : i32
    %58 = arith.cmpi ne, %57, %c0_i32_19 : i32
    scf.if %58 {
      %c0_20 = arith.constant 0 : index
      %c0_21 = arith.constant 0 : index
      %59 = vector.load %arg9[%c0_20, %c0_21] : memref<16x64xf32, #tpu.memory_space<vmem>>, vector<16x64xf32>
      %c0_22 = arith.constant 0 : index
      %c0_23 = arith.constant 0 : index
      %60 = vector.load %arg7[%c0_22, %c0_23] : memref<1x64xf32, #tpu.memory_space<vmem>>, vector<1x64xf32>
      %61 = vector.broadcast %60 : vector<1x64xf32> to vector<16x64xf32>
      %62 = arith.addf %59, %61 : vector<16x64xf32>
      %cst_24 = arith.constant 0.000000e+00 : f32
      %63 = vector.broadcast %cst_24 : f32 to vector<16x64xf32>
      %64 = arith.cmpf ogt, %62, %63 : vector<16x64xf32>
      %cst_25 = arith.constant 0.000000e+00 : f32
      %65 = vector.broadcast %cst_25 : f32 to vector<16x64xf32>
      %66 = arith.minimumf %62, %65 : vector<16x64xf32>
      %67 = math.exp %66 : vector<16x64xf32>
      %cst_26 = arith.constant 1.000000e+00 : f32
      %68 = vector.broadcast %cst_26 : f32 to vector<16x64xf32>
      %69 = arith.subf %67, %68 : vector<16x64xf32>
      %70 = arith.select %64, %62, %69 : vector<16x64xi1>, vector<16x64xf32>
      %71 = arith.truncf %70 : vector<16x64xf32> to vector<16x64xbf16>
      %c0_27 = arith.constant 0 : index
      %c0_28 = arith.constant 0 : index
      %72 = vector.load %arg8[%c0_27, %c0_28] : memref<16x64xbf16, #tpu.memory_space<vmem>>, vector<16x64xbf16>
      tpu.vector_store %arg8[%c0_27, %c0_28], %71 {strides = array<i32>} : memref<16x64xbf16, #tpu.memory_space<vmem>>, vector<16x64xbf16>,
    } else {
    }
    return
  }
  func.func @transform_0(%arg0: i32, %arg1: i32) -> (i32, i32) {
    %c0_i32 = arith.constant 0 : i32
    %c0_i32_0 = arith.constant 0 : i32
    return %arg0, %c0_i32 : i32, i32
  }
  func.func @transform_1(%arg0: i32, %arg1: i32) -> (i32, i32) {
    %c0_i32 = arith.constant 0 : i32
    %c0_i32_0 = arith.constant 0 : i32
    %c0_i32_1 = arith.constant 0 : i32
    return %c0_i32, %c0_i32_0 : i32, i32
  }
  func.func @transform_2(%arg0: i32, %arg1: i32) -> (i32, i32) {
    %c0_i32 = arith.constant 0 : i32
    %c0_i32_0 = arith.constant 0 : i32
    return %arg0, %c0_i32 : i32, i32
  }
  func.func @transform_3(%arg0: i32, %arg1: i32) -> (i32, i32) {
    %c0_i32 = arith.constant 0 : i32
    %c0_i32_0 = arith.constant 0 : i32
    %c0_i32_1 = arith.constant 0 : i32
    return %c0_i32, %c0_i32_0 : i32, i32
  }
  func.func @transform_4(%arg0: i32, %arg1: i32) -> (i32, i32) {
    %c0_i32 = arith.constant 0 : i32
    %c0_i32_0 = arith.constant 0 : i32
    %c0_i32_1 = arith.constant 0 : i32
    return %c0_i32, %c0_i32_0 : i32, i32
  }
  func.func @transform_5(%arg0: i32, %arg1: i32) -> (i32, i32) {
    %c0_i32 = arith.constant 0 : i32
    %c0_i32_0 = arith.constant 0 : i32
    %c0_i32_1 = arith.constant 0 : i32
    return %c0_i32, %c0_i32_0 : i32, i32
  }
  func.func @transform_6(%arg0: i32, %arg1: i32) -> (i32, i32) {
    %c0_i32 = arith.constant 0 : i32
    %c0_i32_0 = arith.constant 0 : i32
    return %arg0, %c0_i32 : i32, i32
  }
}

module attributes {stable_mosaic.version = 11 : i64} {
  func.func @_proj_kernel(%arg0: i32, %arg1: memref<16x64xbf16, #tpu.memory_space<vmem>>, %arg2: memref<64x4xbf16, #tpu.memory_space<vmem>>, %arg3: memref<16x4xbf16, #tpu.memory_space<vmem>>) attributes {dimension_semantics = [#tpu.dimension_semantics<parallel>], iteration_bounds = array<i64: 2>, scalar_prefetch = 0 : i64, scratch_operands = 0 : i64, tpu.core_type = #tpu.core_type<tc>, window_params = [{transform_indices = @transform_0, window_bounds = array<i64: 16, 64>}, {pipeline_mode = #tpu.pipeline_mode<synchronous>, transform_indices = @transform_1, window_bounds = array<i64: 64, 4>}, {transform_indices = @transform_2, window_bounds = array<i64: 16, 4>}]} {
    %c0 = arith.constant 0 : index
    %c0_0 = arith.constant 0 : index
    %0 = vector.load %arg1[%c0, %c0_0] : memref<16x64xbf16, #tpu.memory_space<vmem>>, vector<16x64xbf16>
    %c0_1 = arith.constant 0 : index
    %c0_2 = arith.constant 0 : index
    %1 = vector.load %arg2[%c0_1, %c0_2] : memref<64x4xbf16, #tpu.memory_space<vmem>>, vector<64x4xbf16>
    %cst = arith.constant dense<0.000000e+00> : vector<16x4xf32>
    %2 = tpu.matmul %0, %1, %cst {dimension_numbers = #tpu.dot_dimension_numbers<[1], [0], [0], [1], [0, 0, 1, 1], [], []>} : vector<16x64xbf16>, vector<64x4xbf16>, vector<16x4xf32> -> vector<16x4xf32>
    %3 = arith.truncf %2 : vector<16x4xf32> to vector<16x4xbf16>
    %c0_3 = arith.constant 0 : index
    %c0_4 = arith.constant 0 : index
    %4 = vector.load %arg3[%c0_3, %c0_4] : memref<16x4xbf16, #tpu.memory_space<vmem>>, vector<16x4xbf16>
    tpu.vector_store %arg3[%c0_3, %c0_4], %3 {strides = array<i32>} : memref<16x4xbf16, #tpu.memory_space<vmem>>, vector<16x4xbf16>,
    return
  }
  func.func @transform_0(%arg0: i32) -> (i32, i32) {
    %c0_i32 = arith.constant 0 : i32
    %c0_i32_0 = arith.constant 0 : i32
    return %arg0, %c0_i32 : i32, i32
  }
  func.func @transform_1(%arg0: i32) -> (i32, i32) {
    %c0_i32 = arith.constant 0 : i32
    %c0_i32_0 = arith.constant 0 : i32
    %c0_i32_1 = arith.constant 0 : i32
    return %c0_i32, %c0_i32_0 : i32, i32
  }
  func.func @transform_2(%arg0: i32) -> (i32, i32) {
    %c0_i32 = arith.constant 0 : i32
    %c0_i32_0 = arith.constant 0 : i32
    return %arg0, %c0_i32 : i32, i32
  }
}

module attributes {stable_mosaic.version = 11 : i64} {
  func.func @_gat_layer_kernel(%arg0: i32, %arg1: i32, %arg2: memref<16x4xbf16, #tpu.memory_space<vmem>>, %arg3: memref<32x4xbf16, #tpu.memory_space<vmem>>, %arg4: memref<16x32xf32, #tpu.memory_space<vmem>>, %arg5: memref<4x1xbf16, #tpu.memory_space<vmem>>, %arg6: memref<4x1xbf16, #tpu.memory_space<vmem>>, %arg7: memref<1x4xf32, #tpu.memory_space<vmem>>, %arg8: memref<16x4xf32, #tpu.memory_space<vmem>>, %arg9: memref<16x4xf32, #tpu.memory_space<vmem>>, %arg10: memref<16x1xf32, #tpu.memory_space<vmem>>, %arg11: memref<1x32xf32, #tpu.memory_space<vmem>>) attributes {dimension_semantics = [#tpu.dimension_semantics<parallel>, #tpu.dimension_semantics<arbitrary>], iteration_bounds = array<i64: 2, 1>, scalar_prefetch = 0 : i64, scratch_operands = 3 : i64, tpu.core_type = #tpu.core_type<tc>, window_params = [{transform_indices = @transform_0, window_bounds = array<i64: 16, 4>}, {pipeline_mode = #tpu.pipeline_mode<synchronous>, transform_indices = @transform_1, window_bounds = array<i64: 32, 4>}, {transform_indices = @transform_2, window_bounds = array<i64: 16, 32>}, {pipeline_mode = #tpu.pipeline_mode<synchronous>, transform_indices = @transform_3, window_bounds = array<i64: 4, 1>}, {pipeline_mode = #tpu.pipeline_mode<synchronous>, transform_indices = @transform_4, window_bounds = array<i64: 4, 1>}, {pipeline_mode = #tpu.pipeline_mode<synchronous>, transform_indices = @transform_5, window_bounds = array<i64: 1, 4>}, {transform_indices = @transform_6, window_bounds = array<i64: 16, 4>}]} {
    %c0_i32 = arith.constant 0 : i32
    %0 = arith.cmpi eq, %arg1, %c0_i32 : i32
    %1 = arith.extui %0 : i1 to i32
    %c0_i32_0 = arith.constant 0 : i32
    %2 = arith.cmpi ne, %1, %c0_i32_0 : i32
    scf.if %2 {
      %c0_16 = arith.constant 0 : index
      %c0_17 = arith.constant 0 : index
      %38 = vector.load %arg2[%c0_16, %c0_17] : memref<16x4xbf16, #tpu.memory_space<vmem>>, vector<16x4xbf16>
      %c0_18 = arith.constant 0 : index
      %c0_19 = arith.constant 0 : index
      %39 = vector.load %arg6[%c0_18, %c0_19] : memref<4x1xbf16, #tpu.memory_space<vmem>>, vector<4x1xbf16>
      %cst_20 = arith.constant dense<0.000000e+00> : vector<16x1xf32>
      %40 = tpu.matmul %38, %39, %cst_20 {dimension_numbers = #tpu.dot_dimension_numbers<[1], [0], [0], [1], [0, 0, 1, 1], [], []>} : vector<16x4xbf16>, vector<4x1xbf16>, vector<16x1xf32> -> vector<16x1xf32>
      %c0_21 = arith.constant 0 : index
      %c0_22 = arith.constant 0 : index
      %41 = vector.load %arg10[%c0_21, %c0_22] : memref<16x1xf32, #tpu.memory_space<vmem>>, vector<16x1xf32>
      tpu.vector_store %arg10[%c0_21, %c0_22], %40 {strides = array<i32>} : memref<16x1xf32, #tpu.memory_space<vmem>>, vector<16x1xf32>,
      %c0_23 = arith.constant 0 : index
      %c0_24 = arith.constant 0 : index
      %42 = vector.load %arg5[%c0_23, %c0_24] : memref<4x1xbf16, #tpu.memory_space<vmem>>, vector<4x1xbf16>
      %c0_25 = arith.constant 0 : index
      %c0_26 = arith.constant 0 : index
      %43 = vector.load %arg3[%c0_25, %c0_26] : memref<32x4xbf16, #tpu.memory_space<vmem>>, vector<32x4xbf16>
      %cst_27 = arith.constant dense<0.000000e+00> : vector<1x32xf32>
      %44 = tpu.matmul %42, %43, %cst_27 {dimension_numbers = #tpu.dot_dimension_numbers<[0], [1], [1], [0], [0, 1, 1, 0], [], []>} : vector<4x1xbf16>, vector<32x4xbf16>, vector<1x32xf32> -> vector<1x32xf32>
      %c0_28 = arith.constant 0 : index
      %c0_29 = arith.constant 0 : index
      %45 = vector.load %arg11[%c0_28, %c0_29] : memref<1x32xf32, #tpu.memory_space<vmem>>, vector<1x32xf32>
      tpu.vector_store %arg11[%c0_28, %c0_29], %44 {strides = array<i32>} : memref<1x32xf32, #tpu.memory_space<vmem>>, vector<1x32xf32>,
      %cst_30 = arith.constant 0.000000e+00 : f32
      %46 = vector.broadcast %cst_30 : f32 to vector<16x4xf32>
      %c0_31 = arith.constant 0 : index
      %c0_32 = arith.constant 0 : index
      %47 = vector.load %arg9[%c0_31, %c0_32] : memref<16x4xf32, #tpu.memory_space<vmem>>, vector<16x4xf32>
      tpu.vector_store %arg9[%c0_31, %c0_32], %46 {strides = array<i32>} : memref<16x4xf32, #tpu.memory_space<vmem>>, vector<16x4xf32>,
    } else {
    }
    %c0 = arith.constant 0 : index
    %c0_1 = arith.constant 0 : index
    %3 = vector.load %arg10[%c0, %c0_1] : memref<16x1xf32, #tpu.memory_space<vmem>>, vector<16x1xf32>
    %4 = arith.index_cast %arg1 : i32 to index
    %c0_2 = arith.constant 0 : index
    %5 = vector.load %arg11[%4, %c0_2] : memref<1x32xf32, #tpu.memory_space<vmem>>, vector<1x32xf32>
    %cst = arith.constant dense<0xFF800000> : vector<1xf32>
    %6 = vector.multi_reduction <maximumf>, %5, %cst [1] : vector<1x32xf32> to vector<1xf32>
    %7 = vector.shape_cast %6 : vector<1xf32> to vector<1x1xf32>
    %8 = vector.broadcast %7 : vector<1x1xf32> to vector<16x1xf32>
    %9 = arith.addf %3, %8 : vector<16x1xf32>
    %cst_3 = arith.constant 2.000000e-01 : f32
    %10 = vector.broadcast %cst_3 : f32 to vector<16x1xf32>
    %11 = arith.mulf %10, %9 : vector<16x1xf32>
    %12 = arith.maximumf %9, %11 : vector<16x1xf32>
    %13 = vector.broadcast %3 : vector<16x1xf32> to vector<16x32xf32>
    %14 = vector.broadcast %5 : vector<1x32xf32> to vector<16x32xf32>
    %15 = arith.addf %13, %14 : vector<16x32xf32>
    %c0_4 = arith.constant 0 : index
    %c0_5 = arith.constant 0 : index
    %16 = vector.load %arg4[%c0_4, %c0_5] : memref<16x32xf32, #tpu.memory_space<vmem>>, vector<16x32xf32>
    %17 = arith.addf %15, %16 : vector<16x32xf32>
    %cst_6 = arith.constant 2.000000e-01 : f32
    %18 = vector.broadcast %cst_6 : f32 to vector<16x32xf32>
    %19 = arith.mulf %18, %17 : vector<16x32xf32>
    %20 = arith.maximumf %17, %19 : vector<16x32xf32>
    %21 = vector.broadcast %12 : vector<16x1xf32> to vector<16x32xf32>
    %22 = arith.subf %20, %21 : vector<16x32xf32>
    %23 = math.exp %22 : vector<16x32xf32>
    %cst_7 = arith.constant dense<0.000000e+00> : vector<16xf32>
    %24 = vector.multi_reduction <add>, %23, %cst_7 [1] : vector<16x32xf32> to vector<16xf32>
    %25 = vector.shape_cast %24 : vector<16xf32> to vector<16x1xf32>
    %cst_8 = arith.constant 1.000000e-30 : f32
    %26 = vector.broadcast %cst_8 : f32 to vector<16x1xf32>
    %27 = arith.maximumf %25, %26 : vector<16x1xf32>
    %28 = tpu.reciprocal %27 {approx = true} : vector<16x1xf32> -> vector<16x1xf32>
    %29 = arith.truncf %23 : vector<16x32xf32> to vector<16x32xbf16>
    %c0_9 = arith.constant 0 : index
    %c0_10 = arith.constant 0 : index
    %30 = vector.load %arg3[%c0_9, %c0_10] : memref<32x4xbf16, #tpu.memory_space<vmem>>, vector<32x4xbf16>
    %cst_11 = arith.constant dense<0.000000e+00> : vector<16x4xf32>
    %31 = tpu.matmul %29, %30, %cst_11 {dimension_numbers = #tpu.dot_dimension_numbers<[1], [0], [0], [1], [0, 0, 1, 1], [], []>} : vector<16x32xbf16>, vector<32x4xbf16>, vector<16x4xf32> -> vector<16x4xf32>
    %32 = vector.broadcast %28 : vector<16x1xf32> to vector<16x4xf32>
    %33 = arith.mulf %31, %32 : vector<16x4xf32>
    %c0_12 = arith.constant 0 : index
    %c0_13 = arith.constant 0 : index
    %34 = vector.load %arg9[%c0_12, %c0_13] : memref<16x4xf32, #tpu.memory_space<vmem>>, vector<16x4xf32>
    tpu.vector_store %arg9[%c0_12, %c0_13], %33 {strides = array<i32>} : memref<16x4xf32, #tpu.memory_space<vmem>>, vector<16x4xf32>,
    %c0_i32_14 = arith.constant 0 : i32
    %35 = arith.cmpi eq, %arg1, %c0_i32_14 : i32
    %36 = arith.extui %35 : i1 to i32
    %c0_i32_15 = arith.constant 0 : i32
    %37 = arith.cmpi ne, %36, %c0_i32_15 : i32
    scf.if %37 {
      %c0_16 = arith.constant 0 : index
      %c0_17 = arith.constant 0 : index
      %38 = vector.load %arg9[%c0_16, %c0_17] : memref<16x4xf32, #tpu.memory_space<vmem>>, vector<16x4xf32>
      %c0_18 = arith.constant 0 : index
      %c0_19 = arith.constant 0 : index
      %39 = vector.load %arg7[%c0_18, %c0_19] : memref<1x4xf32, #tpu.memory_space<vmem>>, vector<1x4xf32>
      %40 = vector.broadcast %39 : vector<1x4xf32> to vector<16x4xf32>
      %41 = arith.addf %38, %40 : vector<16x4xf32>
      %cst_20 = arith.constant dense<0xFF800000> : vector<16xf32>
      %42 = vector.multi_reduction <maximumf>, %41, %cst_20 [1] : vector<16x4xf32> to vector<16xf32>
      %43 = vector.shape_cast %42 : vector<16xf32> to vector<16x1xf32>
      %44 = vector.broadcast %43 : vector<16x1xf32> to vector<16x4xf32>
      %45 = arith.subf %41, %44 : vector<16x4xf32>
      %46 = math.exp %45 : vector<16x4xf32>
      %cst_21 = arith.constant dense<0.000000e+00> : vector<16xf32>
      %47 = vector.multi_reduction <add>, %46, %cst_21 [1] : vector<16x4xf32> to vector<16xf32>
      %48 = vector.shape_cast %47 : vector<16xf32> to vector<16x1xf32>
      %49 = math.log %48 : vector<16x1xf32>
      %50 = vector.broadcast %49 : vector<16x1xf32> to vector<16x4xf32>
      %51 = arith.subf %45, %50 : vector<16x4xf32>
      %c0_22 = arith.constant 0 : index
      %c0_23 = arith.constant 0 : index
      %52 = vector.load %arg8[%c0_22, %c0_23] : memref<16x4xf32, #tpu.memory_space<vmem>>, vector<16x4xf32>
      tpu.vector_store %arg8[%c0_22, %c0_23], %51 {strides = array<i32>} : memref<16x4xf32, #tpu.memory_space<vmem>>, vector<16x4xf32>,
    } else {
    }
    return
  }
  func.func @transform_0(%arg0: i32, %arg1: i32) -> (i32, i32) {
    %c0_i32 = arith.constant 0 : i32
    %c0_i32_0 = arith.constant 0 : i32
    return %arg0, %c0_i32 : i32, i32
  }
  func.func @transform_1(%arg0: i32, %arg1: i32) -> (i32, i32) {
    %c0_i32 = arith.constant 0 : i32
    %c0_i32_0 = arith.constant 0 : i32
    %c0_i32_1 = arith.constant 0 : i32
    return %c0_i32, %c0_i32_0 : i32, i32
  }
  func.func @transform_2(%arg0: i32, %arg1: i32) -> (i32, i32) {
    %c0_i32 = arith.constant 0 : i32
    %c0_i32_0 = arith.constant 0 : i32
    return %arg0, %c0_i32 : i32, i32
  }
  func.func @transform_3(%arg0: i32, %arg1: i32) -> (i32, i32) {
    %c0_i32 = arith.constant 0 : i32
    %c0_i32_0 = arith.constant 0 : i32
    %c0_i32_1 = arith.constant 0 : i32
    return %c0_i32, %c0_i32_0 : i32, i32
  }
  func.func @transform_4(%arg0: i32, %arg1: i32) -> (i32, i32) {
    %c0_i32 = arith.constant 0 : i32
    %c0_i32_0 = arith.constant 0 : i32
    %c0_i32_1 = arith.constant 0 : i32
    return %c0_i32, %c0_i32_0 : i32, i32
  }
  func.func @transform_5(%arg0: i32, %arg1: i32) -> (i32, i32) {
    %c0_i32 = arith.constant 0 : i32
    %c0_i32_0 = arith.constant 0 : i32
    %c0_i32_1 = arith.constant 0 : i32
    return %c0_i32, %c0_i32_0 : i32, i32
  }
  func.func @transform_6(%arg0: i32, %arg1: i32) -> (i32, i32) {
    %c0_i32 = arith.constant 0 : i32
    %c0_i32_0 = arith.constant 0 : i32
    return %arg0, %c0_i32 : i32, i32
  }
}

</mosaic_0001>

<bundles_post_ra>
// kernel: pygat_forward.4
= control target key start
LH: loop header
LB: loop body
LE: loop exit
PB: predicated region body
PF: predicated region fallthrough
CT: control target
= control target key end

     0   :  { %s332_s9 = smov 0   ;;  %s352_s0 = inlined_call_operand.vmem [shape: f32[32,16], index: 0, kind: input, shape index: {}]   ;;  %s353_s1 = inlined_call_operand.vmem [shape: bf16[16,64], index: 1, kind: input, shape index: {}]   ;;  %s354_s2 = inlined_call_operand.vmem [shape: bf16[32,64], index: 2, kind: output, shape index: {}]  }
   0x1 LB: > { %s271_s10 = sadd.s32 4294967295, %s313_s9   ;;  %p275_p0 = scmp.ge.s32.totalorder %s313_s9, 1  ;;  %s313_s9 = sphi %s332_s9, %s12_s9  }
   0x2   : > { %p113_p1 = scmp.lt.s32.totalorder %s313_s9, 3 }
   0x4   : > { %p114_p2 = pnand %p275_p0, %p113_p1 }
   0x5   : > { %v306_v0 = vld [vmem:[%s353_s1] sm:$0xff] (!%p114_p2)   ;;  %v315_v1 = vmov (!%p114_p2), 0.0   ;;  %s276_s13 = sshll.u32 (!%p114_p2), %s271_s10, 1  ;;  %vm316_vm0 = vmmov (!%p114_p2), 0   ;;  %vm159_vm1 = vcmask (!%p114_p2), 130048   ;;  %vm212_vm2 = vcmask (!%p114_p2), 519168  }
   0x6   : > { %117 = sbr.rel (%p114_p2) target bundleno = 236 (0xec), region = 28  ;;  %290 = vmatprep.subr.bf16.mxu0 (!%p114_p2), %v315_v1  ;;  %292 = vmatprep.mubr.msk.bf16.mxu0 (!%p114_p2), %vm316_vm0, %v315_v1  ;;  %p136_p3 = scmp.lt.s32.totalorder (!%p114_p2), %s276_s13, 3 }
   0x7   : > { %291 = vmatpush3.bf16.msra.mxu0 (!%p114_p2), %v306_v0 }
   0xd   : > { %s356_s13 = smov (!%p136_p3, %s276_s13), 3 }
   0xe   : > { %s277_s14 = sshll.u32 %s356_s13, 3  ;;  %s279_s18 = sshll.u32 %s356_s13, 2 }
   0xf   : > { %s139_s17 = scalar_lea.vmem %s352_s0, %s277_s14  ;;  %s145_s21 = scalar_lea.vmem %s354_s2, %s279_s18 }
  0x10   : > { %v148_v2 = vld [vmem:[%s139_s17] sm:$0xff]  ;;  %v149_v3 = vld [vmem:[%s139_s17 + $0x8] sm:$0xff] }
  0x11   : > { %v150_v4 = vpack.c.bf16 %v149_v3, %v148_v2 }
  0x13   : > { %293 = vmatmul.mubr.msk.bf16.vlgmr.msra.gmra.mrb[0].mxu0 %vm159_vm1, %v150_v4 }
  0xe6   : > { %v197_v5 = vpop.f32.mrb[0].mxu0 }
  0xe7   : > { %v286_v6 = vpack.c.bf16 %v197_v5, %v197_v5  ;;  %v294_v7 = vpop.f32.mrb[1].mxu0 }
  0xe8   : > { %v200_v8 = vpop.f32.mrb[2].mxu0 }
  0xe9   : > { %213 = vst.msk [vmem:[%s145_s21] sm:$0xf] %vm212_vm2, %v286_v6  ;;  %v287_v9 = vpack.c.bf16 %v200_v8, %v200_v8  ;;  %v295_v10 = vpop.f32.mrb[3].mxu0 }
  0xeb   : > { %214 = vst.msk [vmem:[%s145_s21 + $0x4] sm:$0xf] %vm212_vm2, %v287_v9 }
  0xec PF: > { %s12_s9 = sadd.s32 1, %s313_s9  }
  0xed   : > { %p9_p4 = scmp.ge.s32.totalorder %s12_s9, 4  }
  0xef   :  { %11 = sbr.rel (!%p9_p4) target bundleno = 1 (0x1), region = 58 }

// kernel: pygat_forward.6
= control target key start
LH: loop header
LB: loop body
LE: loop exit
PB: predicated region body
PF: predicated region fallthrough
CT: control target
= control target key end

     0   :  { %s377_s9 = smov 0   ;;  %s406_s0 = inlined_call_operand.vmem [shape: bf16[32,64], index: 0, kind: input, shape index: {}]   ;;  %s407_s1 = inlined_call_operand.vmem [shape: bf16[64,4], index: 1, kind: input, shape index: {}]   ;;  %s408_s2 = inlined_call_operand.vmem [shape: bf16[32,4], index: 2, kind: output, shape index: {}]  }
   0x1 LB: > { %s299_s10 = sadd.s32 4294967295, %s358_s9   ;;  %p303_p0 = scmp.ge.s32.totalorder %s358_s9, 1  ;;  %s358_s9 = sphi %s377_s9, %s12_s9  }
   0x2   : > { %p113_p1 = scmp.lt.s32.totalorder %s358_s9, 3 }
   0x4   : > { %p114_p2 = pnand %p303_p0, %p113_p1 }
   0x5   : > { %v347_v0 = vld [vmem:[%s407_s1] sm:$0xff] (!%p114_p2)   ;;  %v360_v1 = vmov (!%p114_p2), 0.0   ;;  %v348_v2 = vld [vmem:[%s407_s1 + $0x8] sm:$0xff] (!%p114_p2)   ;;  %vm361_vm0 = vmmov (!%p114_p2), 0   ;;  %s304_s15 = sshll.u32 (!%p114_p2), %s299_s10, 1  ;;  %v349_v3 = vld [vmem:[%s407_s1 + $0x10] sm:$0xff] (!%p114_p2)  }
   0x6   : > { %117 = sbr.rel (%p114_p2) target bundleno = 239 (0xef), region = 28  ;;  %325 = vmatprep.subr.bf16.mxu0 (!%p114_p2), %v360_v1  ;;  %333 = vmatprep.mubr.msk.bf16.mxu0 (!%p114_p2), %vm361_vm0, %v360_v1  ;;  %p136_p3 = scmp.lt.s32.totalorder (!%p114_p2), %s304_s15, 3  ;;  %v350_v4 = vld [vmem:[%s407_s1 + $0x18] sm:$0xff] (!%p114_p2)   ;;  %vm187_vm1 = vcmask (!%p114_p2), 523264   ;;  %vm240_vm2 = vcmask (!%p114_p2), 27648  }
   0x7   : > { %326 = vmatpush3.bf16.msra.mxu0 (!%p114_p2), %v347_v0 }
   0x8   : > { %327 = vmatprep.subr.bf16.mxu0 (!%p114_p2), %v360_v1 }
   0xb   : > { %328 = vmatpush3.bf16.msra.mxu0 (!%p114_p2), %v348_v2 }
   0xc   : > { %329 = vmatprep.subr.bf16.mxu0 (!%p114_p2), %v360_v1 }
   0xd   : > { %s410_s15 = smov (!%p136_p3, %s304_s15), 3 }
   0xe   : > { %s305_s18 = sshll.u32 %s410_s15, 2 }
   0xf   : > { %s139_s21 = scalar_lea.vmem %s406_s0, %s305_s18  ;;  %330 = vmatpush3.bf16.msra.mxu0 %v349_v3  ;;  %s145_s26 = scalar_lea.vmem %s408_s2, %s305_s18 }
  0x10   : > { %331 = vmatprep.subr.bf16.mxu0 %v360_v1  ;;  %v351_v5 = vld [vmem:[%s139_s21] sm:$0xff]  }
  0x13   : > { %332 = vmatpush3.bf16.msra.mxu0 %v350_v4 }
  0x16   : > { %334 = vmatmul.mubr.msk.bf16.vlgmr.msra.gmra.mrb[0].mxu0 %vm187_vm1, %v351_v5 }
  0xe9   : > { %v225_v6 = vpop.f32.mrb[0].mxu0 }
  0xea   : > { %v318_v7 = vpack.c.bf16 %v225_v6, %v225_v6  ;;  %v335_v8 = vpop.f32.mrb[1].mxu0 }
  0xeb   : > { %v228_v9 = vpop.f32.mrb[2].mxu0 }
  0xec   : > { %241 = vst.msk [vmem:[%s145_s26] sm:$0xf] %vm240_vm2, %v318_v7  ;;  %v319_v10 = vpack.c.bf16 %v228_v9, %v228_v9  ;;  %v336_v11 = vpop.f32.mrb[3].mxu0 }
  0xee   : > { %242 = vst.msk [vmem:[%s145_s26 + $0x4] sm:$0xf] %vm240_vm2, %v319_v10 }
  0xef PF: > { %s12_s9 = sadd.s32 1, %s358_s9  }
  0xf0   : > { %p9_p4 = scmp.ge.s32.totalorder %s12_s9, 4  }
  0xf2   :  { %11 = sbr.rel (!%p9_p4) target bundleno = 1 (0x1), region = 58 }

// kernel: pygat_forward.5
= control target key start
LH: loop header
LB: loop body
LE: loop exit
PB: predicated region body
PF: predicated region fallthrough
CT: control target
= control target key end

     0   :  { %s985_s21 = smov 0   ;;  %s987_s22 = smov 0   ;;  %s1107_s0 = inlined_call_operand.vmem [shape: bf16[32,64], index: 0, kind: input, shape index: {}, may-alias: {0,1}]   ;;  %s1108_s1 = inlined_call_operand.vmem [shape: bf16[32,64], index: 1, kind: input, shape index: {}, may-alias: {0,1}]   ;;  %s1109_s2 = inlined_call_operand.vmem [shape: f32[32,32], index: 2, kind: input, shape index: {}]   ;;  %s1110_s3 = inlined_call_operand.vmem [shape: bf16[64,8], index: 3, kind: input, shape index: {}]   ;;  %s1111_s4 = inlined_call_operand.vmem [shape: bf16[64,8], index: 4, kind: input, shape index: {}]   ;;  %s1112_s5 = inlined_call_operand.vmem [shape: f32[1,64], index: 5, kind: input, shape index: {}]   ;;  %s1113_s6 = inlined_call_operand.vmem [shape: bf16[32,64], index: 6, kind: output, shape index: {}]  }
   0x1   :  { %s989_s23 = smov 0   ;;  %s991_s24 = smov 0  }
   0x2   :  { %s993_s25 = smov 0  }
   0x3 LB: > { %s25_s26 = sadd.s32 1, %s936_s23  ;;  %s28_s27 = sadd.s32 1, %s940_s24  ;;  %s944_s25 = sphi %s993_s25, %s16_s25   ;;  %s940_s24 = sphi %s991_s24, %s1117_s24   ;;  %s936_s23 = sphi %s989_s23, %s1116_s23   ;;  %s932_s22 = sphi %s987_s22, %s1115_s22   ;;  %s928_s21 = sphi %s985_s21, %s1114_s21  }
   0x4   : > { %p26_p0 = scmp.ge.s32.totalorder %s25_s26, 8  ;;  %p762_p1 = scmp.ge.s32.totalorder %s944_s25, 1 }
   0x5   : > { %p236_p2 = scmp.lt.s32.totalorder %s944_s25, 17 }
   0x6   : > { %s1119_s26 = smov (%p26_p0, %s25_s26), 0  ;;  %s1121_s27 = smov (!%p26_p0, %s28_s27), %s940_s24 }
   0x7   : > { %p237_p3 = pnand %p762_p1, %p236_p2  ;;  %p30_p4 = scmp.ge.s32.totalorder %s1121_s27, 2 }
   0x8   : > { %s763_s28 = sshll.u32 (!%p237_p3), %s932_s22, 1  ;;  %p769_p6 = scmp.ne.s32.totalorder (!%p237_p3), %s928_s21, 0 }
   0x9   : > { %s1123_s27 = smov (%p30_p4, %s1121_s27), 0  ;;  %240 = sbr.rel (%p237_p3) target bundleno = 763 (0x2fb), region = 44 }
   0xa   : > { %p272_p5 = scmp.lt.s32.totalorder (!%p237_p3), %s763_s28, 3 }
  0x10   : > { %s1125_s28 = smov (!%p272_p5, %s763_s28), 3  ;;  %293 = sbr.rel (%p769_p6) target bundleno = 337 (0x151), region = 48 }
  0x11   : > { %s764_s29 = sshll.u32 %s1125_s28, 2  ;;  %s766_s30 = sshll.u32 %s1125_s28, 3  ;;  %v881_v0 = vld [vmem:[%s1110_s3] sm:$0xff] (!%p769_p6)   ;;  %v946_v1 = vmov (!%p769_p6), 0.0   ;;  %v882_v2 = vld [vmem:[%s1110_s3 + $0x8] sm:$0xff] (!%p769_p6)   ;;  %vm333_vm0 = vcmask (!%p769_p6), 523264  }
  0x12   : > { %s1020_s9 = scalar_lea.vmem %s1107_s0, %s764_s29  ;;  %s1025_s12 = scalar_lea.vmem %s1109_s2, %s766_s30  ;;  %808 = vmatprep.subr.bf16.mxu0 (!%p769_p6), %v946_v1  ;;  %820 = vmatprep.subr.bf16.mxu1 (!%p769_p6), %v946_v1  ;;  %v883_v3 = vld [vmem:[%s1110_s3 + $0x10] sm:$0xff] (!%p769_p6)   ;;  %v885_v4 = vld [vmem:[%s1111_s4] sm:$0xff] (!%p769_p6)   ;;  %494 = vst.msk [vmem:[#allocation2] sm:$0xff] (!%p769_p6), %vm333_vm0, %v946_v1  ;;  %495 = vst.msk [vmem:[#allocation2 + $0x8] sm:$0xff] (!%p769_p6), %vm333_vm0, %v946_v1  ;;  %vm947_vm1 = vmmov (!%p769_p6), 0   ;;  %vm378_vm2 = vcmask (!%p769_p6), 64512  }
  0x13   : > { %s1030_s15 = scalar_lea.vmem %s1113_s6, %s764_s29  ;;  %417 = vxpose.xlu0.c.b16.start [1/4] (short) (narrow) (!%p769_p6), %v881_v0, 16  ;;  %v886_v5 = vld [vmem:[%s1108_s1] sm:$0xff] (!%p769_p6)   ;;  %816 = vmatprep.mubr.msk.bf16.mxu0 (!%p769_p6), %vm947_vm1, %v946_v1  ;;  %v887_v6 = vld [vmem:[%s1111_s4 + $0x8] sm:$0xff] (!%p769_p6)   ;;  %v884_v8 = vld [vmem:[%s1110_s3 + $0x18] sm:$0xff] (!%p769_p6)   ;;  %vm492_vm3 = vcmask (!%p769_p6), 261120  }
  0x14   : > { %824 = vmatprep.mubr.msk.bf16.mxu1 (!%p769_p6), %vm947_vm1, %v946_v1  ;;  %809 = vmatpush3.bf16.msra.mxu0 (!%p769_p6), %v885_v4  ;;  %v447_v7 = vsel (!%p769_p6), %vm333_vm0, %v886_v5, 0  ;;  %v889_v9 = vld [vmem:[%s1108_s1 + $0x8] sm:$0xff] (!%p769_p6)   ;;  %v888_v10 = vld [vmem:[%s1111_s4 + $0x10] sm:$0xff] (!%p769_p6)   ;;  %v890_v12 = vld [vmem:[%s1111_s4 + $0x18] sm:$0xff] (!%p769_p6)  }
  0x15   : > { %810 = vmatprep.subr.bf16.mxu0 (!%p769_p6), %v946_v1  ;;  %821 = vmatpush3.bf16.xpose.msra.mxu1 (!%p769_p6), %v447_v7  ;;  %v450_v11 = vsel (!%p769_p6), %vm333_vm0, %v889_v9, 0  ;;  %v891_v13 = vld [vmem:[%s1020_s9] sm:$0xff] (!%p769_p6)  }
  0x16   : > { %822 = vmatprep.subr.bf16.mxu1 (!%p769_p6), %v946_v1 }
  0x17   : > { %418 = vxpose.xlu0.c.b16.cont [2/4] (short) (narrow) %v882_v2, 16 }
  0x18   : > { %811 = vmatpush3.bf16.msra.mxu0 %v887_v6 }
  0x19   : > { %812 = vmatprep.subr.bf16.mxu0 %v946_v1 }
  0x1b   : > { %419 = vxpose.xlu0.c.b16.cont [3/4] (short) (narrow) %v883_v3, 16 }
  0x1c   : > { %813 = vmatpush3.bf16.msra.mxu0 %v888_v10 }
  0x1d   : > { %814 = vmatprep.subr.bf16.mxu0 %v946_v1  ;;  %823 = vmatpush3.bf16.xpose.msra.mxu1 %v450_v11 }
  0x1f   : > { %420 = vxpose.xlu0.c.b16.end [4/4] (short) (narrow) %v884_v8, 16 }
  0x20   : > { %815 = vmatpush3.bf16.msra.mxu0 %v890_v12 }
  0x23   : > { %817 = vmatmul.mubr.msk.bf16.vlgmr.msra.gmra.mrb[0].mxu0 %vm333_vm0, %v891_v13 }
  0x79   : > { %v425_v14 = vpop.trf.xlu0 }
  0x7a   : > { %825 = vmatmul.mubr.msk.bf16.vlgmr.msra.gmra.mrb[0].mxu1 %vm333_vm0, %v425_v14 }
  0xf6   : > { %v371_v15 = vpop.f32.mrb[0].mxu0 }
  0xf7   : > { %379 = vst.msk [vmem:[#allocation3] sm:$0xff] %vm378_vm2, %v371_v15  ;;  %v818_v16 = vpop.f32.mrb[1].mxu0 }
  0xf8   : > { %v374_v17 = vpop.f32.mrb[2].mxu0 }
  0xf9   : > { %380 = vst.msk [vmem:[#allocation3 + $0x8] sm:$0xff] %vm378_vm2, %v374_v17  ;;  %v819_v18 = vpop.f32.mrb[3].mxu0 }
 0x14d   : > { %v486_v19 = vpop.f32.mrb[0].mxu1 }
 0x14e   : > { %493 = vst.msk [vmem:[#allocation4] sm:$0xff] %vm492_vm3, %v486_v19  ;;  %v826_v20 = vpop.f32.mrb[1].mxu1 }
 0x14f   : > { %v489_v21 = vpop.f32.mrb[2].mxu1 }
 0x150   : > { %v827_v22 = vpop.f32.mrb[3].mxu1 }
 0x151 PF: > { %vm515_vm4 = vcmask 253952   ;;  %v496_v23 = vlaneseq  ;;  %v500_v24 = vld [vmem:[#allocation3] sm:$0xff]  ;;  %s513_s9 = scalar_lea.vmem [#allocation4], %s928_s21  ;;  %v498_v26 = vstv %s928_s21  ;;  %v501_v30 = vld [vmem:[#allocation3 + $0x8] sm:$0xff]  ;;  %vm506_vm5 = vcmask 64512   ;;  %v892_v37 = vld [vmem:[%s1108_s1] sm:$0xff]  }
 0x152   : > { %v948_v38 = vmov 0.0   ;;  %v893_v39 = vld [vmem:[%s1108_s1 + $0x8] sm:$0xff]   ;;  %vm949_vm7 = vmmov 0   ;;  %v535_v42 = vld [vmem:[%s1025_s12] sm:$0xff]  ;;  %vm549_vm8 = vcmask 261120   ;;  %vm636_vm12 = vcmask 523264  }
 0x153   : > { %v520_v28 = vshrl.u32 %v496_v23, 7  ;;  %v1072_v29 = vand.u32 127, %v496_v23  ;;  %828 = vmatprep.subr.bf16.mxu0 %v948_v38  ;;  %832 = vmatprep.mubr.msk.bf16.mxu0 %vm949_vm7, %v948_v38  ;;  %v536_v48 = vld [vmem:[%s1025_s12 + $0x8] sm:$0xff]  ;;  %s786_s12 = sshll.u32 %s928_s21, 3  ;;  %v630_v13 = vld [vmem:[#allocation2] sm:$0xff]  ;;  %p787_p7 = scmp.ne.s32.totalorder %s928_s21, 7 }
 0x154   : > { %829 = vmatpush3.bf16.msra.mxu0 %v892_v37  ;;  %s626_s7 = sadd.s32 8, %s786_s12  ;;  %v624_v9 = vstv %s786_s12  ;;  %v631_v18 = vld [vmem:[#allocation2 + $0x8] sm:$0xff]  ;;  %vm674_vm15 = vcmask (!%p787_p7), 519168  }
 0x155   : > { %v514_v25 = vld [vmem:[%s513_s9] sm:$0x1]  ;;  %v521_v31 = vsub.s32 0, %v520_v28  ;;  %vm499_vm6 = vcmp.eq.s32.totalorder %v1072_v29, %v498_v26  ;;  %830 = vmatprep.subr.bf16.mxu0 %v948_v38  ;;  %v627_v10 = vstv %s626_s7  ;;  %vm625_vm9 = vcmp.ge.s32.totalorder %v1072_v29, %v624_v9 }
 0x156   : > { %v516_v27 = vsel %vm515_vm4, %v514_v25, -inf  ;;  %v504_v32 = vsel %vm499_vm6, %v500_v24, 0.0  ;;  %v505_v33 = vsel %vm499_vm6, %v501_v30, 0.0  ;;  %vm628_vm10 = vcmp.lt.s32.totalorder %v1072_v29, %v627_v10 }
 0x157   : > { %517 = vmax.xlane.f32.xlu1 %v516_v27  ;;  %v532_v34 = vrot.slane %v514_v25, %v521_v31  ;;  %v507_v35 = vsel %vm506_vm5, %v504_v32, 0.0  ;;  %v510_v36 = vsel %vm506_vm5, %v505_v33, 0.0  ;;  %vm629_vm11 = vmand %vm625_vm9, %vm628_vm10  ;;  %v788_v25 = vld [vmem:[%s1112_s5] ss:$0 sm:$0xff] (!%p787_p7) }
 0x158   : > { %508 = vadd.xlane.f32.xlu0 %v507_v35  ;;  %831 = vmatpush3.bf16.msra.mxu0 %v893_v39 }
 0x15c   : > { %511 = vadd.xlane.f32.xlu0 %v510_v36 }
 0x1e4   : > { %v518_v40 = vpop.xlane.xlu1 %517 }
 0x1e5   : > { %v522_v41 = vrot.slane %v518_v40, %v521_v31  ;;  %v509_v43 = vpop.xlane.xlu0 %508 }
 0x1e6   : > { %v533_v45 = vadd.f32 %v532_v34, %v509_v43 }
 0x1e7   : > { %v523_v44 = vadd.f32 %v522_v41, %v509_v43 }
 0x1e8   : > { %v537_v47 = vadd.f32 %v535_v42, %v533_v45 }
 0x1e9   : > { %v525_v46 = vmul.f32 0.2, %v523_v44  ;;  %v512_v49 = vpop.xlane.xlu0 %511 }
 0x1ea   : > { %v539_v50 = vmul.f32 0.2, %v537_v47  ;;  %v524_v51 = vadd.f32 %v522_v41, %v512_v49  ;;  %v534_v52 = vadd.f32 %v532_v34, %v512_v49 }
 0x1eb   : > { %v527_v53 = vmax.f32 %v523_v44, %v525_v46 }
 0x1ec   : > { %v541_v54 = vmax.f32 %v537_v47, %v539_v50  ;;  %v526_v55 = vmul.f32 0.2, %v524_v51  ;;  %v538_v56 = vadd.f32 %v536_v48, %v534_v52 }
 0x1ee   : > { %v543_v57 = vsub.f32 %v541_v54, %v527_v53  ;;  %v540_v58 = vmul.f32 0.2, %v538_v56  ;;  %v528_v60 = vmax.f32 %v524_v51, %v526_v55 }
 0x1f0   : > { %v545_v59 = vmul.f32 1.442695, %v543_v57  ;;  %v542_v61 = vmax.f32 %v538_v56, %v540_v58 }
 0x1f2   : > { %894 = vpow2.f32 %v545_v59  ;;  %v544_v62 = vsub.f32 %v542_v61, %v528_v60 }
 0x1f4   : > { %v547_v63 = vmul.f32 1.442695, %v544_v62 }
 0x1f6   : > { %896 = vpow2.f32 %v547_v63 }
 0x1fc   : > { %v895_v0 = vpop.eup %894 }
 0x1fd   : > { %v550_v1 = vsel %vm549_vm8, %v895_v0, 0.0 }
 0x1fe   : > { %551 = vadd.xlane.f32.xlu1 %v550_v1 }
 0x200   : > { %v897_v2 = vpop.eup %896 }
 0x201   : > { %v553_v3 = vsel %vm549_vm8, %v897_v2, 0.0  ;;  %v560_v4 = vpack.c.bf16 %v897_v2, %v895_v0 }
 0x202   : > { %554 = vadd.xlane.f32.xlu0 %v553_v3 }
 0x203   : > { %833 = vmatmul.mubr.msk.bf16.vlgmr.msra.gmra.mrb[0].mxu0 %vm549_vm8, %v560_v4 }
 0x28b   : > { %v552_v5 = vpop.xlane.xlu1 %551 }
 0x28c   : > { %v556_v7 = vmax.f32 %v552_v5, 1e-30 }
 0x28e   : > { %898 = vrcp.f32 %v556_v7 }
 0x28f   : > { %v555_v6 = vpop.xlane.xlu0 %554 }
 0x290   : > { %v557_v8 = vmax.f32 %v555_v6, 1e-30 }
 0x292   : > { %900 = vrcp.f32 %v557_v8 }
 0x298   : > { %v899_v11 = vpop.eup %898 }
 0x29c   : > { %v901_v16 = vpop.eup %900 }
 0x2d6   : > { %v614_v12 = vpop.f32.mrb[0].mxu0  ;;  %642 = sbr.rel (%p787_p7) target bundleno = 763 (0x2fb), region = 52 }
 0x2d7   : > { %v621_v14 = vmul.f32 %v899_v11, %v614_v12  ;;  %v834_v15 = vpop.f32.mrb[1].mxu0 }
 0x2d8   : > { %v617_v17 = vpop.f32.mrb[2].mxu0 }
 0x2d9   : > { %v634_v19 = vsel %vm629_vm11, %v621_v14, %v630_v13  ;;  %v622_v20 = vmul.f32 %v901_v16, %v617_v17  ;;  %v835_v21 = vpop.f32.mrb[3].mxu0 }
 0x2da   : > { %637 = vst.msk [vmem:[#allocation2] sm:$0xff] %vm636_vm12, %v634_v19 }
 0x2db   : > { %v635_v22 = vsel %vm629_vm11, %v622_v20, %v631_v18 }
 0x2dc   : > { %638 = vst.msk [vmem:[#allocation2 + $0x8] sm:$0xff] %vm636_vm12, %v635_v22 }
 0x2e1   : > { %v643_v23 = vld [vmem:[#allocation2] sm:$0xff] }
 0x2e2   : > { %v652_v26 = vadd.f32 %v788_v25, %v643_v23 }
 0x2e3   : > { %v644_v24 = vld [vmem:[#allocation2 + $0x8] sm:$0xff] }
 0x2e4   : > { %v653_v27 = vadd.f32 %v788_v25, %v644_v24  ;;  %v656_v28 = vmin.f32 %v652_v26, 0.0  ;;  %vm654_vm13 = vcmp.gt.f32.partialorder %v652_v26, 0.0 }
 0x2e6   : > { %v657_v29 = vmin.f32 %v653_v27, 0.0  ;;  %v658_v30 = vmul.f32 1.442695, %v656_v28  ;;  %vm655_vm14 = vcmp.gt.f32.partialorder %v653_v27, 0.0 }
 0x2e8   : > { %v660_v31 = vmul.f32 1.442695, %v657_v29  ;;  %902 = vpow2.f32 %v658_v30 }
 0x2ea   : > { %904 = vpow2.f32 %v660_v31 }
 0x2f2   : > { %v903_v32 = vpop.eup %902 }
 0x2f3   : > { %v789_v34 = vadd.f32 -1.0, %v903_v32 }
 0x2f4   : > { %v905_v33 = vpop.eup %904 }
 0x2f5   : > { %v790_v35 = vadd.f32 -1.0, %v905_v33  ;;  %v664_v36 = vsel %vm654_vm13, %v652_v26, %v789_v34 }
 0x2f6   : > { %v795_v37 = vpack.c.bf16 %v664_v36, %v664_v36 }
 0x2f7   : > { %v665_v38 = vsel %vm655_vm14, %v653_v27, %v790_v35 }
 0x2f8   : > { %v796_v39 = vpack.c.bf16 %v665_v38, %v665_v38  ;;  %675 = vst.msk [vmem:[%s1030_s15] sm:$0xf] %vm674_vm15, %v795_v37 }
 0x2fa   : > { %676 = vst.msk [vmem:[%s1030_s15 + $0x4] sm:$0xf] %vm674_vm15, %v796_v39 }
 0x2fb PF: > { %s16_s25 = sadd.s32 1, %s944_s25   ;;  %s1114_s21 = smov %s936_s23 }
 0x2fc   : > { %p13_p8 = scmp.ge.s32.totalorder %s16_s25, 18   ;;  %s1115_s22 = smov %s940_s24 }
 0x2fd   : > { %s1116_s23 = smov %s1119_s26  ;;  %s1117_s24 = smov %s1123_s27 }
 0x2fe   :  { %15 = sbr.rel (!%p13_p8) target bundleno = 3 (0x3), region = 86 }

// kernel: pygat_forward.7
= control target key start
LH: loop header
LB: loop body
LE: loop exit
PB: predicated region body
PF: predicated region fallthrough
CT: control target
= control target key end

     0   :  { %s857_s21 = smov 0   ;;  %s859_s22 = smov 0   ;;  %s952_s0 = inlined_call_operand.vmem [shape: bf16[32,4], index: 0, kind: input, shape index: {}, may-alias: {0,1}]   ;;  %s953_s1 = inlined_call_operand.vmem [shape: bf16[32,4], index: 1, kind: input, shape index: {}, may-alias: {0,1}]   ;;  %s954_s2 = inlined_call_operand.vmem [shape: f32[32,32], index: 2, kind: input, shape index: {}]   ;;  %s955_s3 = inlined_call_operand.vmem [shape: bf16[4,1], index: 3, kind: input, shape index: {}]   ;;  %s956_s4 = inlined_call_operand.vmem [shape: bf16[4,1], index: 4, kind: input, shape index: {}]   ;;  %s957_s5 = inlined_call_operand.vmem [shape: f32[1,4], index: 5, kind: input, shape index: {}]   ;;  %s958_s6 = inlined_call_operand.vmem [shape: f32[32,4], index: 6, kind: output, shape index: {}]  }
   0x1   :  { %s861_s23 = smov 0  }
   0x2 LB: > { %s28_s24 = sadd.s32 1, %s813_s22  ;;  %p697_p0 = scmp.ge.s32.totalorder %s817_s23, 1  ;;  %s817_s23 = sphi %s861_s23, %s16_s23   ;;  %s813_s22 = sphi %s859_s22, %s960_s22   ;;  %s809_s21 = sphi %s857_s21, %s959_s21  }
   0x3   : > { %p30_p1 = scmp.ge.s32.totalorder %s28_s24, 2  ;;  %p236_p2 = scmp.lt.s32.totalorder %s817_s23, 3 }
   0x5   : > { %s962_s24 = smov (%p30_p1, %s28_s24), 0  ;;  %p237_p3 = pnand %p697_p0, %p236_p2 }
   0x6   : > { %v354_v0 = vld [vmem:[%s955_s3] sm:$0x3] (!%p237_p3)  ;;  %vm306_vm0 = vcmask (!%p237_p3), 1041408   ;;  %v819_v2 = vmov (!%p237_p3), 0.0   ;;  %s698_s29 = sshll.u32 (!%p237_p3), %s809_s21, 1  ;;  %vm302_vm1 = vcmask (!%p237_p3), 31744   ;;  %v446_v23 = vlaneseq (!%p237_p3) }
   0x7   : > { %240 = sbr.rel (%p237_p3) target bundleno = 1175 (0x497), region = 44  ;;  %v296_v1 = vld [vmem:[%s956_s4] sm:$0x3] (!%p237_p3)  ;;  %359 = vxpose.xlu0.c.b16.start.end [1/1] (short) (narrow) (!%p237_p3), %v354_v0, 16  ;;  %723 = vmatprep.subr.bf16.mxu0 (!%p237_p3), %v819_v2  ;;  %vm820_vm2 = vmmov (!%p237_p3), 0   ;;  %p272_p4 = scmp.lt.s32.totalorder (!%p237_p3), %s698_s29, 3 }
   0x8   : > { %v308_v3 = vsel (!%p237_p3), %vm306_vm0, %v296_v1, 0  ;;  %v775_v4 = vld [vmem:[%s953_s1] sm:$0xff] (!%p237_p3)   ;;  %725 = vmatprep.mubr.msk.bf16.mxu0 (!%p237_p3), %vm820_vm2, %v819_v2  ;;  %436 = vst.msk [vmem:[#allocation2] sm:$0xff] (!%p237_p3), %vm302_vm1, %v819_v2  ;;  %437 = vst.msk [vmem:[#allocation2 + $0x8] sm:$0xff] (!%p237_p3), %vm302_vm1, %v819_v2  ;;  %729 = vmatprep.subr.bf16.mxu1 (!%p237_p3), %v819_v2  ;;  %v776_v6 = vld [vmem:[%s953_s1 + $0x8] sm:$0xff] (!%p237_p3)   ;;  %v821_v9 = vmov (!%p237_p3), 0  }
   0x9   : > { %724 = vmatpush3.bf16.msra.mxu0 (!%p237_p3), %v308_v3  ;;  %v389_v5 = vsel (!%p237_p3), %vm302_vm1, %v775_v4, 0  ;;  %733 = vmatprep.mubr.msk.bf16.mxu1 (!%p237_p3), %vm820_vm2, %v819_v2  ;;  %v392_v8 = vsel (!%p237_p3), %vm302_vm1, %v776_v6, 0  ;;  %vm351_vm3 = vcmask (!%p237_p3), 7168   ;;  %vm434_vm4 = vcmask (!%p237_p3), 253952   ;;  %v777_v34 = vld [vmem:[%s953_s1] sm:$0xff] (!%p237_p3)   ;;  %v778_v35 = vld [vmem:[%s953_s1 + $0x8] sm:$0xff] (!%p237_p3)  }
   0xa   : > { %730 = vmatpush3.bf16.xpose.msra.mxu1 (!%p237_p3), %v389_v5  ;;  %737 = vmatprep.subr.bf16.mxu0 (!%p237_p3), %v819_v2  ;;  %v447_v24 = vshrl.u32 (!%p237_p3), %v446_v23, 7  ;;  %vm498_vm5 = vcmask (!%p237_p3), 261120  }
   0xb   : > { %731 = vmatprep.subr.bf16.mxu1 (!%p237_p3), %v819_v2  ;;  %772 = vset.pattern.permute.xlu1 (!%p237_p3), %v821_v9 }
   0xc   : > { %v448_v25 = vsub.s32 (!%p237_p3), 0, %v447_v24 }
   0xe   : > { %s964_s29 = smov (!%p272_p4, %s698_s29), 3 }
   0xf   : > { %s699_s10 = sshll.u32 %s964_s29, 2  ;;  %s701_s18 = sshll.u32 %s964_s29, 3 }
  0x10   : > { %s275_s13 = scalar_lea.vmem %s952_s0, %s699_s10  ;;  %773 = vset.pattern.permute.xlu0 %v821_v9  ;;  %s281_s21 = scalar_lea.vmem %s954_s2, %s701_s18 }
  0x11   : > { %v774_v7 = vld [vmem:[%s275_s13] sm:$0xff]   ;;  %v475_v43 = vld [vmem:[%s281_s21 + $0x8] sm:$0xff]  ;;  %s287_s30 = scalar_lea.vmem %s958_s6, %s701_s18 }
  0x12   : > { %726 = vmatmul.mubr.msk.bf16.vlgmr.msra.gmra.mrb[0].mxu0 %vm302_vm1, %v774_v7  ;;  %732 = vmatpush3.bf16.xpose.msra.mxu1 %v392_v8  ;;  %v474_v39 = vld [vmem:[%s281_s21] sm:$0xff] }
  0x13   : > { %741 = vmatprep.mubr.msk.bf16.mxu0 %vm820_vm2, %v819_v2  ;;  %738 = vmatpush3.bf16.msra.mxu0 %v777_v34  ;;  %v712_v8 = vld [vmem:[%s957_s5] ss:$0 sm:$0xff] }
  0x14   : > { %739 = vmatprep.subr.bf16.mxu0 %v819_v2 }
  0x17   : > { %740 = vmatpush3.bf16.msra.mxu0 %v778_v35 }
  0x6d   : > { %v367_v10 = vpop.trf.xlu0 }
  0x6e   : > { %734 = vmatmul.mubr.msk.bf16.vlgmr.msra.gmra.mrb[0].mxu1 %vm302_vm1, %v367_v10 }
  0xe5   : > { %v344_v11 = vpop.f32.mrb[0].mxu0 }
  0xe6   : > { %352 = vst.msk [vmem:[#allocation3] sm:$0xff] %vm351_vm3, %v344_v11  ;;  %v727_v12 = vpop.f32.mrb[1].mxu0 }
  0xe7   : > { %v347_v13 = vpop.f32.mrb[2].mxu0 }
  0xe8   : > { %353 = vst.msk [vmem:[#allocation3 + $0x8] sm:$0xff] %vm351_vm3, %v347_v13  ;;  %v728_v14 = vpop.f32.mrb[3].mxu0 }
  0xed   : > { %v438_v15 = vld [vmem:[#allocation3] sm:$0xff] }
  0xee   : > { %458 = vperm.xlu1 %772, %v438_v15  }
  0xef   : > { %v439_v16 = vld [vmem:[#allocation3 + $0x8] sm:$0xff] }
  0xf2   : > { %463 = vperm.xlu1 %772, %v439_v16  }
 0x141   : > { %v428_v17 = vpop.f32.mrb[0].mxu1 }
 0x142   : > { %435 = vst.msk [vmem:[#allocation4] sm:$0x1] %vm434_vm4, %v428_v17  ;;  %v735_v18 = vpop.f32.mrb[1].mxu1 }
 0x143   : > { %v431_v19 = vpop.f32.mrb[2].mxu1 }
 0x144   : > { %v736_v20 = vpop.f32.mrb[3].mxu1 }
 0x149   : > { %v441_v21 = vld [vmem:[#allocation4] sm:$0x1] }
 0x14a   : > { %v443_v22 = vsel %vm434_vm4, %v441_v21, -inf  ;;  %v470_v37 = vrot.slane %v441_v21, %v448_v25 }
 0x14b   : > { %444 = vmax.xlane.f32.xlu0 %v443_v22 }
 0x16d   : > { %v459_v36 = vpop.permute.xlu1 %458 }
 0x16e   : > { %v472_v38 = vadd.f32 %v470_v37, %v459_v36 }
 0x170   : > { %v476_v41 = vadd.f32 %v474_v39, %v472_v38 }
 0x171   : > { %v464_v40 = vpop.permute.xlu1 %463 }
 0x172   : > { %v473_v42 = vadd.f32 %v470_v37, %v464_v40  ;;  %v478_v45 = vmul.f32 0.2, %v476_v41 }
 0x174   : > { %v477_v44 = vadd.f32 %v475_v43, %v473_v42  ;;  %v480_v46 = vmax.f32 %v476_v41, %v478_v45 }
 0x176   : > { %v479_v47 = vmul.f32 0.2, %v477_v44 }
 0x178   : > { %v481_v51 = vmax.f32 %v477_v44, %v479_v47 }
 0x1d8   : > { %v445_v26 = vpop.xlane.xlu0 %444 }
 0x1d9   : > { %v449_v27 = vrot.slane %v445_v26, %v448_v25 }
 0x1db   : > { %v450_v28 = vadd.f32 %v449_v27, %v438_v15  ;;  %v451_v29 = vadd.f32 %v449_v27, %v439_v16 }
 0x1dd   : > { %v452_v30 = vmul.f32 0.2, %v450_v28  ;;  %v453_v31 = vmul.f32 0.2, %v451_v29 }
 0x1df   : > { %v454_v32 = vmax.f32 %v450_v28, %v452_v30  ;;  %v455_v33 = vmax.f32 %v451_v29, %v453_v31 }
 0x1e1   : > { %484 = vperm.xlu1 %772, %v454_v32  }
 0x1e5   : > { %489 = vperm.xlu1 %772, %v455_v33  }
 0x260   : > { %v485_v48 = vpop.permute.xlu1 %484 }
 0x261   : > { %v492_v49 = vsub.f32 %v480_v46, %v485_v48 }
 0x263   : > { %v494_v50 = vmul.f32 1.442695, %v492_v49 }
 0x264   : > { %v490_v52 = vpop.permute.xlu1 %489 }
 0x265   : > { %779 = vpow2.f32 %v494_v50  ;;  %v493_v53 = vsub.f32 %v481_v51, %v490_v52 }
 0x267   : > { %v496_v54 = vmul.f32 1.442695, %v493_v53 }
 0x269   : > { %781 = vpow2.f32 %v496_v54 }
 0x26f   : > { %v780_v55 = vpop.eup %779 }
 0x270   : > { %v499_v56 = vsel %vm498_vm5, %v780_v55, 0.0 }
 0x271   : > { %500 = vadd.xlane.f32.xlu1 %v499_v56 }
 0x273   : > { %v782_v57 = vpop.eup %781 }
 0x274   : > { %v502_v58 = vsel %vm498_vm5, %v782_v57, 0.0  ;;  %v509_v59 = vpack.c.bf16 %v782_v57, %v780_v55 }
 0x275   : > { %503 = vadd.xlane.f32.xlu0 %v502_v58 }
 0x276   : > { %742 = vmatmul.mubr.msk.bf16.vlgmr.msra.gmra.mrb[4].mxu0 %vm498_vm5, %v509_v59 }
 0x2fe   : > { %v501_v60 = vpop.xlane.xlu1 %500 }
 0x2ff   : > { %v505_v62 = vmax.f32 %v501_v60, 1e-30 }
 0x301   : > { %783 = vrcp.f32 %v505_v62 }
 0x302   : > { %v504_v61 = vpop.xlane.xlu0 %503 }
 0x303   : > { %v506_v63 = vmax.f32 %v504_v61, 1e-30 }
 0x305   : > { %785 = vrcp.f32 %v506_v63 }
 0x30b   : > { %v784_v0 = vpop.eup %783 }
 0x30f   : > { %v786_v4 = vpop.eup %785 }
 0x349   : > { %v563_v1 = vpop.f32.mrb[4].mxu0 }
 0x34a   : > { %v570_v2 = vmul.f32 %v784_v0, %v563_v1  ;;  %v743_v3 = vpop.f32.mrb[5].mxu0 }
 0x34b   : > { %v566_v5 = vpop.f32.mrb[6].mxu0 }
 0x34c   : > { %573 = vst.msk [vmem:[#allocation2] sm:$0xff] %vm302_vm1, %v570_v2  ;;  %v571_v6 = vmul.f32 %v786_v4, %v566_v5  ;;  %v744_v7 = vpop.f32.mrb[7].mxu0 }
 0x34e   : > { %574 = vst.msk [vmem:[#allocation2 + $0x8] sm:$0xff] %vm302_vm1, %v571_v6 }
 0x353   : > { %v578_v9 = vld [vmem:[#allocation2] sm:$0xff] }
 0x354   : > { %v587_v10 = vadd.f32 %v712_v8, %v578_v9 }
 0x355   : > { %v579_v11 = vld [vmem:[#allocation2 + $0x8] sm:$0xff] }
 0x356   : > { %v589_v12 = vsel %vm302_vm1, %v587_v10, -inf  ;;  %v588_v13 = vadd.f32 %v712_v8, %v579_v11 }
 0x357   : > { %590 = vmax.xlane.f32.xlu0 %v589_v12 }
 0x358   : > { %v592_v14 = vsel %vm302_vm1, %v588_v13, -inf }
 0x35b   : > { %593 = vmax.xlane.f32.xlu0 %v592_v14 }
 0x3e4   : > { %v591_v15 = vpop.xlane.xlu0 %590 }
 0x3e5   : > { %v595_v16 = vsub.f32 %v587_v10, %v591_v15 }
 0x3e7   : > { %v597_v17 = vmul.f32 1.442695, %v595_v16 }
 0x3e8   : > { %v594_v18 = vpop.xlane.xlu0 %593 }
 0x3e9   : > { %787 = vpow2.f32 %v597_v17  ;;  %v596_v19 = vsub.f32 %v588_v13, %v594_v18 }
 0x3eb   : > { %v599_v20 = vmul.f32 1.442695, %v596_v19 }
 0x3ed   : > { %789 = vpow2.f32 %v599_v20 }
 0x3f3   : > { %v788_v21 = vpop.eup %787 }
 0x3f4   : > { %v601_v22 = vsel %vm302_vm1, %v788_v21, 0.0 }
 0x3f5   : > { %602 = vadd.xlane.f32.xlu0 %v601_v22 }
 0x3f7   : > { %v790_v23 = vpop.eup %789 }
 0x3f8   : > { %v604_v24 = vsel %vm302_vm1, %v790_v23, 0.0 }
 0x3f9   : > { %605 = vadd.xlane.f32.xlu0 %v604_v24 }
 0x482   : > { %v603_v25 = vpop.xlane.xlu0 %602 }
 0x483   : > { %791 = vlog2.f32 %v603_v25 }
 0x486   : > { %v606_v26 = vpop.xlane.xlu0 %605 }
 0x487   : > { %793 = vlog2.f32 %v606_v26 }
 0x48d   : > { %v792_v27 = vpop.eup %791 }
 0x48e   : > { %v608_v28 = vmul.f32 0.6931472, %v792_v27 }
 0x490   : > { %v611_v29 = vsub.f32 %v595_v16, %v608_v28 }
 0x491   : > { %v794_v30 = vpop.eup %793 }
 0x492   : > { %613 = vst.msk [vmem:[%s287_s30] sm:$0xff] %vm302_vm1, %v611_v29  ;;  %v610_v31 = vmul.f32 0.6931472, %v794_v30 }
 0x494   : > { %v612_v32 = vsub.f32 %v596_v19, %v610_v31 }
 0x496   : > { %614 = vst.msk [vmem:[%s287_s30 + $0x8] sm:$0xff] %vm302_vm1, %v612_v32 }
 0x497 PF: > { %s16_s23 = sadd.s32 1, %s817_s23   ;;  %s959_s21 = smov %s813_s22 }
 0x498   : > { %p13_p5 = scmp.ge.s32.totalorder %s16_s23, 4   ;;  %s960_s22 = smov %s962_s24 }
 0x49a   :  { %15 = sbr.rel (!%p13_p5) target bundleno = 2 (0x2), region = 86 }

</bundles_post_ra>
